<compile_context>
chip_gen: v5e
topology: v5e:2x2
jax: 0.10.0
libtpu: 0.0.40
codegen_flags: <defaults>
</compile_context>

<pallas_src>
import functools

import jax
import jax.numpy as jnp
from jax.experimental import pallas as pl
from jax.experimental.pallas import tpu as pltpu


def conv_tap_kernel(x_ref, w_ref, b_ref, o_ref, *, H, W, KH, KW):
    """One image per grid step.

    x_ref: (C, H*W + 2*PAD)  lane-padded, flattened (row-major) channels-first image (bf16)
    w_ref: (KH*KW, OC, C)    per-tap weight matrices
    b_ref: (OC, 1)           bias (f32)
    o_ref: (OC, H*W)         lane-dense output block (f32)
    """
    HW = H * W
    PAD = W * (KH // 2) + (KW // 2)          # left/right zero pad in flattened-lane space
    OC = o_ref.shape[0]

    xin = x_ref[...].astype(jnp.float32)     # single load of the whole block, f32 compute
    col = jax.lax.broadcasted_iota(jnp.int32, (1, HW), 1) % W   # x-coordinate of each lane

    acc = jnp.zeros((OC, HW), jnp.float32)
    t = 0
    for a in range(-(KH // 2), KH // 2 + 1):         # unrolled at trace time (9 taps)
        for b in range(-(KW // 2), KW // 2 + 1):
            s = a * W + b                            # flattened offset of tap (a, b)
            start = PAD + s                          # static slice start in [0, 2*PAD]
            tap = xin[:, start:start + HW]           # (C, HW)
            # Vertical out-of-image reads land in the zero pad; only the horizontal
            # wrap-around (x+b outside [0, W)) needs masking.
            if b < 0:
                tap = jnp.where(col >= -b, tap, 0.0)
            elif b > 0:
                tap = jnp.where(col < W - b, tap, 0.0)
            w_t = w_ref[t].astype(jnp.float32)       # (OC, C)
            acc = acc + jnp.dot(w_t, tap, preferred_element_type=jnp.float32)
            t += 1

    acc = acc + b_ref[...]                           # (OC, 1) broadcast over lanes
    o_ref[...] = jnp.maximum(acc, 0.0).astype(o_ref.dtype)


def conv_backbone_forward(x, weight, bias, *, compute_dtype=jnp.bfloat16):
    """x: (N, C, H, W) f32; weight: (OC, C, KH, KW); bias: (OC,). Returns (N, OC, H, W) f32."""
    N, C, H, W = x.shape
    OC, _, KH, KW = weight.shape
    HW = H * W
    PAD = W * (KH // 2) + (KW // 2)
    HWp = HW + 2 * PAD

    # Free reshape (no transpose) + tiny lane pad + bf16 cast -> ~0.5x HBM read vs f32,
    # ~9x less traffic than the old im2col patch matrix.
    x_flat = x.reshape(N, C, HW).astype(compute_dtype)
    x_pad = jnp.pad(x_flat, ((0, 0), (0, 0), (PAD, PAD)))

    # Tiny (1 KiB) weight relayout: (OC, C, KH, KW) -> (KH*KW, OC, C).
    w_taps = jnp.transpose(weight, (2, 3, 0, 1)).reshape(KH * KW, OC, C).astype(compute_dtype)
    b_col = bias.reshape(OC, 1).astype(jnp.float32)

    kernel = functools.partial(conv_tap_kernel, H=H, W=W, KH=KH, KW=KW)

    out_flat = pl.pallas_call(
        kernel,
        out_shape=jax.ShapeDtypeStruct((N, OC, HW), jnp.float32),
        grid_spec=pltpu.PrefetchScalarGridSpec(
            num_scalar_prefetch=0,
            grid=(N,),
            in_specs=[
                pl.BlockSpec((None, C, HWp), lambda n: (n, 0, 0)),
                pl.BlockSpec((KH * KW, OC, C), lambda n: (0, 0, 0)),
                pl.BlockSpec((OC, 1), lambda n: (0, 0)),
            ],
            out_specs=pl.BlockSpec((None, OC, HW), lambda n: (n, 0, 0)),
        ),
        compiler_params=pltpu.CompilerParams(
            dimension_semantics=("parallel",),
            vmem_limit_bytes=32 * 1024 * 1024,
        ),
    )(x_pad, w_taps, b_col)

    # Free reshape back to NCHW -- no transpose pass over the activation.
    return out_flat.reshape(N, OC, H, W)


if __name__ == "__main__":
    key = jax.random.PRNGKey(0)
    kx, kw, kb = jax.random.split(key, 3)

    N, C, H, W = 2, 4, 16, 16
    OC, KH, KW = 8, 3, 3

    x = jax.random.normal(kx, (N, C, H, W), dtype=jnp.float32)
    weight = jax.random.normal(kw, (OC, C, KH, KW), dtype=jnp.float32) * 0.1
    bias = jax.random.normal(kb, (OC,), dtype=jnp.float32) * 0.1

    out = conv_backbone_forward(x, weight, bias)
    out = jax.block_until_ready(out)

    # Reference check (same bf16 input rounding as the kernel, f32 accumulation).
    x_r = x.astype(jnp.bfloat16).astype(jnp.float32)
    w_r = weight.astype(jnp.bfloat16).astype(jnp.float32)
    ref = jax.lax.conv_general_dilated(
        x_r, w_r, window_strides=(1, 1), padding="SAME",
        dimension_numbers=("NCHW", "OIHW", "NCHW"),
        precision=jax.lax.Precision.HIGHEST)
    ref = jnp.maximum(ref + bias.reshape(1, OC, 1, 1), 0.0)

    assert out.shape == (N, OC, H, W)
    assert jnp.allclose(out, ref, atol=2e-3, rtol=2e-3)

    print("KERNEL_OK")
</pallas_src>

<mosaic_0001>
module attributes {stable_mosaic.version = 11 : i64} {
  func.func @conv_tap_kernel(%arg0: i32, %arg1: memref<1x4x290xbf16, #tpu.memory_space<vmem>>, %arg2: memref<9x8x4xbf16, #tpu.memory_space<vmem>>, %arg3: memref<8x1xf32, #tpu.memory_space<vmem>>, %arg4: memref<1x8x256xf32, #tpu.memory_space<vmem>>) attributes {dimension_semantics = [#tpu.dimension_semantics<parallel>], iteration_bounds = array<i64: 2>, scalar_prefetch = 0 : i64, scratch_operands = 0 : i64, tpu.core_type = #tpu.core_type<tc>, window_params = [{transform_indices = @transform_0, window_bounds = array<i64: 1, 4, 290>}, {pipeline_mode = #tpu.pipeline_mode<synchronous>, transform_indices = @transform_1, window_bounds = array<i64: 9, 8, 4>}, {pipeline_mode = #tpu.pipeline_mode<synchronous>, transform_indices = @transform_2, window_bounds = array<i64: 8, 1>}, {transform_indices = @transform_3, window_bounds = array<i64: 1, 8, 256>}]} {
    %c0 = arith.constant 0 : index
    %c0_0 = arith.constant 0 : index
    %c0_1 = arith.constant 0 : index
    %0 = vector.load %arg1[%c0, %c0_0, %c0_1] : memref<1x4x290xbf16, #tpu.memory_space<vmem>>, vector<1x4x290xbf16>
    %1 = vector.shape_cast %0 : vector<1x4x290xbf16> to vector<4x290xbf16>
    %2 = arith.extf %1 : vector<4x290xbf16> to vector<4x290xf32>
    %3 = tpu.iota {dimensions = array<i32: 1>} : vector<1x256xi32>
    %c16_i32 = arith.constant 16 : i32
    %c0_i32 = arith.constant 0 : i32
    %4 = arith.cmpi eq, %c16_i32, %c0_i32 : i32
    %c1_i32 = arith.constant 1 : i32
    %5 = arith.select %4, %c1_i32, %c16_i32 : i32
    %6 = vector.broadcast %5 : i32 to vector<1x256xi32>
    %7 = arith.remsi %3, %6 : vector<1x256xi32>
    %c0_i32_2 = arith.constant 0 : i32
    %8 = vector.broadcast %c0_i32_2 : i32 to vector<1x256xi32>
    %9 = arith.cmpi ne, %7, %8 : vector<1x256xi32>
    %c0_i32_3 = arith.constant 0 : i32
    %10 = vector.broadcast %c0_i32_3 : i32 to vector<1x256xi32>
    %11 = arith.cmpi slt, %7, %10 : vector<1x256xi32>
    %c0_i32_4 = arith.constant 0 : i32
    %12 = arith.cmpi slt, %5, %c0_i32_4 : i32
    %13 = vector.broadcast %12 : i1 to vector<1x256xi1>
    %14 = vector.broadcast %13 : vector<1x256xi1> to vector<1x256xi1>
    %15 = arith.xori %11, %14 : vector<1x256xi1>
    %16 = arith.andi %15, %9 : vector<1x256xi1>
    %17 = vector.broadcast %5 : i32 to vector<1x256xi32>
    %18 = arith.addi %7, %17 : vector<1x256xi32>
    %19 = arith.select %16, %18, %7 : vector<1x256xi1>, vector<1x256xi32>
    %cst = arith.constant 0.000000e+00 : f32
    %20 = vector.broadcast %cst : f32 to vector<8x256xf32>
    %21 = vector.extract_strided_slice %2 {offsets = [0, 0], sizes = [4, 256], strides = [1, 1]} : vector<4x290xf32> to vector<4x256xf32>
    %c1_i32_5 = arith.constant 1 : i32
    %22 = vector.broadcast %c1_i32_5 : i32 to vector<1x256xi32>
    %23 = arith.cmpi sge, %19, %22 : vector<1x256xi32>
    %cst_6 = arith.constant 0.000000e+00 : f32
    %24 = vector.shape_cast %23 : vector<1x256xi1> to vector<1x256xi1>
    %25 = vector.broadcast %24 : vector<1x256xi1> to vector<4x256xi1>
    %26 = vector.broadcast %cst_6 : f32 to vector<4x256xf32>
    %27 = arith.select %25, %21, %26 : vector<4x256xi1>, vector<4x256xf32>
    %c0_7 = arith.constant 0 : index
    %c0_8 = arith.constant 0 : index
    %c0_9 = arith.constant 0 : index
    %28 = vector.load %arg2[%c0_7, %c0_8, %c0_9] : memref<9x8x4xbf16, #tpu.memory_space<vmem>>, vector<1x8x4xbf16>
    %29 = vector.shape_cast %28 : vector<1x8x4xbf16> to vector<8x4xbf16>
    %30 = arith.extf %29 : vector<8x4xbf16> to vector<8x4xf32>
    %cst_10 = arith.constant dense<0.000000e+00> : vector<8x256xf32>
    %31 = tpu.matmul %30, %27, %cst_10 {dimension_numbers = #tpu.dot_dimension_numbers<[1], [0], [0], [1], [0, 0, 1, 1], [], []>} : vector<8x4xf32>, vector<4x256xf32>, vector<8x256xf32> -> vector<8x256xf32>
    %32 = arith.addf %20, %31 : vector<8x256xf32>
    %33 = vector.extract_strided_slice %2 {offsets = [0, 1], sizes = [4, 256], strides = [1, 1]} : vector<4x290xf32> to vector<4x256xf32>
    %c1 = arith.constant 1 : index
    %c0_11 = arith.constant 0 : index
    %c0_12 = arith.constant 0 : index
    %34 = vector.load %arg2[%c1, %c0_11, %c0_12] : memref<9x8x4xbf16, #tpu.memory_space<vmem>>, vector<1x8x4xbf16>
    %35 = vector.shape_cast %34 : vector<1x8x4xbf16> to vector<8x4xbf16>
    %36 = arith.extf %35 : vector<8x4xbf16> to vector<8x4xf32>
    %cst_13 = arith.constant dense<0.000000e+00> : vector<8x256xf32>
    %37 = tpu.matmul %36, %33, %cst_13 {dimension_numbers = #tpu.dot_dimension_numbers<[1], [0], [0], [1], [0, 0, 1, 1], [], []>} : vector<8x4xf32>, vector<4x256xf32>, vector<8x256xf32> -> vector<8x256xf32>
    %38 = arith.addf %32, %37 : vector<8x256xf32>
    %39 = vector.extract_strided_slice %2 {offsets = [0, 2], sizes = [4, 256], strides = [1, 1]} : vector<4x290xf32> to vector<4x256xf32>
    %c15_i32 = arith.constant 15 : i32
    %40 = vector.broadcast %c15_i32 : i32 to vector<1x256xi32>
    %41 = arith.cmpi slt, %19, %40 : vector<1x256xi32>
    %cst_14 = arith.constant 0.000000e+00 : f32
    %42 = vector.shape_cast %41 : vector<1x256xi1> to vector<1x256xi1>
    %43 = vector.broadcast %42 : vector<1x256xi1> to vector<4x256xi1>
    %44 = vector.broadcast %cst_14 : f32 to vector<4x256xf32>
    %45 = arith.select %43, %39, %44 : vector<4x256xi1>, vector<4x256xf32>
    %c2 = arith.constant 2 : index
    %c0_15 = arith.constant 0 : index
    %c0_16 = arith.constant 0 : index
    %46 = vector.load %arg2[%c2, %c0_15, %c0_16] : memref<9x8x4xbf16, #tpu.memory_space<vmem>>, vector<1x8x4xbf16>
    %47 = vector.shape_cast %46 : vector<1x8x4xbf16> to vector<8x4xbf16>
    %48 = arith.extf %47 : vector<8x4xbf16> to vector<8x4xf32>
    %cst_17 = arith.constant dense<0.000000e+00> : vector<8x256xf32>
    %49 = tpu.matmul %48, %45, %cst_17 {dimension_numbers = #tpu.dot_dimension_numbers<[1], [0], [0], [1], [0, 0, 1, 1], [], []>} : vector<8x4xf32>, vector<4x256xf32>, vector<8x256xf32> -> vector<8x256xf32>
    %50 = arith.addf %38, %49 : vector<8x256xf32>
    %51 = vector.extract_strided_slice %2 {offsets = [0, 16], sizes = [4, 256], strides = [1, 1]} : vector<4x290xf32> to vector<4x256xf32>
    %c1_i32_18 = arith.constant 1 : i32
    %52 = vector.broadcast %c1_i32_18 : i32 to vector<1x256xi32>
    %53 = arith.cmpi sge, %19, %52 : vector<1x256xi32>
    %cst_19 = arith.constant 0.000000e+00 : f32
    %54 = vector.shape_cast %53 : vector<1x256xi1> to vector<1x256xi1>
    %55 = vector.broadcast %54 : vector<1x256xi1> to vector<4x256xi1>
    %56 = vector.broadcast %cst_19 : f32 to vector<4x256xf32>
    %57 = arith.select %55, %51, %56 : vector<4x256xi1>, vector<4x256xf32>
    %c3 = arith.constant 3 : index
    %c0_20 = arith.constant 0 : index
    %c0_21 = arith.constant 0 : index
    %58 = vector.load %arg2[%c3, %c0_20, %c0_21] : memref<9x8x4xbf16, #tpu.memory_space<vmem>>, vector<1x8x4xbf16>
    %59 = vector.shape_cast %58 : vector<1x8x4xbf16> to vector<8x4xbf16>
    %60 = arith.extf %59 : vector<8x4xbf16> to vector<8x4xf32>
    %cst_22 = arith.constant dense<0.000000e+00> : vector<8x256xf32>
    %61 = tpu.matmul %60, %57, %cst_22 {dimension_numbers = #tpu.dot_dimension_numbers<[1], [0], [0], [1], [0, 0, 1, 1], [], []>} : vector<8x4xf32>, vector<4x256xf32>, vector<8x256xf32> -> vector<8x256xf32>
    %62 = arith.addf %50, %61 : vector<8x256xf32>
    %63 = vector.extract_strided_slice %2 {offsets = [0, 17], sizes = [4, 256], strides = [1, 1]} : vector<4x290xf32> to vector<4x256xf32>
    %c4 = arith.constant 4 : index
    %c0_23 = arith.constant 0 : index
    %c0_24 = arith.constant 0 : index
    %64 = vector.load %arg2[%c4, %c0_23, %c0_24] : memref<9x8x4xbf16, #tpu.memory_space<vmem>>, vector<1x8x4xbf16>
    %65 = vector.shape_cast %64 : vector<1x8x4xbf16> to vector<8x4xbf16>
    %66 = arith.extf %65 : vector<8x4xbf16> to vector<8x4xf32>
    %cst_25 = arith.constant dense<0.000000e+00> : vector<8x256xf32>
    %67 = tpu.matmul %66, %63, %cst_25 {dimension_numbers = #tpu.dot_dimension_numbers<[1], [0], [0], [1], [0, 0, 1, 1], [], []>} : vector<8x4xf32>, vector<4x256xf32>, vector<8x256xf32> -> vector<8x256xf32>
    %68 = arith.addf %62, %67 : vector<8x256xf32>
    %69 = vector.extract_strided_slice %2 {offsets = [0, 18], sizes = [4, 256], strides = [1, 1]} : vector<4x290xf32> to vector<4x256xf32>
    %c15_i32_26 = arith.constant 15 : i32
    %70 = vector.broadcast %c15_i32_26 : i32 to vector<1x256xi32>
    %71 = arith.cmpi slt, %19, %70 : vector<1x256xi32>
    %cst_27 = arith.constant 0.000000e+00 : f32
    %72 = vector.shape_cast %71 : vector<1x256xi1> to vector<1x256xi1>
    %73 = vector.broadcast %72 : vector<1x256xi1> to vector<4x256xi1>
    %74 = vector.broadcast %cst_27 : f32 to vector<4x256xf32>
    %75 = arith.select %73, %69, %74 : vector<4x256xi1>, vector<4x256xf32>
    %c5 = arith.constant 5 : index
    %c0_28 = arith.constant 0 : index
    %c0_29 = arith.constant 0 : index
    %76 = vector.load %arg2[%c5, %c0_28, %c0_29] : memref<9x8x4xbf16, #tpu.memory_space<vmem>>, vector<1x8x4xbf16>
    %77 = vector.shape_cast %76 : vector<1x8x4xbf16> to vector<8x4xbf16>
    %78 = arith.extf %77 : vector<8x4xbf16> to vector<8x4xf32>
    %cst_30 = arith.constant dense<0.000000e+00> : vector<8x256xf32>
    %79 = tpu.matmul %78, %75, %cst_30 {dimension_numbers = #tpu.dot_dimension_numbers<[1], [0], [0], [1], [0, 0, 1, 1], [], []>} : vector<8x4xf32>, vector<4x256xf32>, vector<8x256xf32> -> vector<8x256xf32>
    %80 = arith.addf %68, %79 : vector<8x256xf32>
    %81 = vector.extract_strided_slice %2 {offsets = [0, 32], sizes = [4, 256], strides = [1, 1]} : vector<4x290xf32> to vector<4x256xf32>
    %c1_i32_31 = arith.constant 1 : i32
    %82 = vector.broadcast %c1_i32_31 : i32 to vector<1x256xi32>
    %83 = arith.cmpi sge, %19, %82 : vector<1x256xi32>
    %cst_32 = arith.constant 0.000000e+00 : f32
    %84 = vector.shape_cast %83 : vector<1x256xi1> to vector<1x256xi1>
    %85 = vector.broadcast %84 : vector<1x256xi1> to vector<4x256xi1>
    %86 = vector.broadcast %cst_32 : f32 to vector<4x256xf32>
    %87 = arith.select %85, %81, %86 : vector<4x256xi1>, vector<4x256xf32>
    %c6 = arith.constant 6 : index
    %c0_33 = arith.constant 0 : index
    %c0_34 = arith.constant 0 : index
    %88 = vector.load %arg2[%c6, %c0_33, %c0_34] : memref<9x8x4xbf16, #tpu.memory_space<vmem>>, vector<1x8x4xbf16>
    %89 = vector.shape_cast %88 : vector<1x8x4xbf16> to vector<8x4xbf16>
    %90 = arith.extf %89 : vector<8x4xbf16> to vector<8x4xf32>
    %cst_35 = arith.constant dense<0.000000e+00> : vector<8x256xf32>
    %91 = tpu.matmul %90, %87, %cst_35 {dimension_numbers = #tpu.dot_dimension_numbers<[1], [0], [0], [1], [0, 0, 1, 1], [], []>} : vector<8x4xf32>, vector<4x256xf32>, vector<8x256xf32> -> vector<8x256xf32>
    %92 = arith.addf %80, %91 : vector<8x256xf32>
    %93 = vector.extract_strided_slice %2 {offsets = [0, 33], sizes = [4, 256], strides = [1, 1]} : vector<4x290xf32> to vector<4x256xf32>
    %c7 = arith.constant 7 : index
    %c0_36 = arith.constant 0 : index
    %c0_37 = arith.constant 0 : index
    %94 = vector.load %arg2[%c7, %c0_36, %c0_37] : memref<9x8x4xbf16, #tpu.memory_space<vmem>>, vector<1x8x4xbf16>
    %95 = vector.shape_cast %94 : vector<1x8x4xbf16> to vector<8x4xbf16>
    %96 = arith.extf %95 : vector<8x4xbf16> to vector<8x4xf32>
    %cst_38 = arith.constant dense<0.000000e+00> : vector<8x256xf32>
    %97 = tpu.matmul %96, %93, %cst_38 {dimension_numbers = #tpu.dot_dimension_numbers<[1], [0], [0], [1], [0, 0, 1, 1], [], []>} : vector<8x4xf32>, vector<4x256xf32>, vector<8x256xf32> -> vector<8x256xf32>
    %98 = arith.addf %92, %97 : vector<8x256xf32>
    %99 = vector.extract_strided_slice %2 {offsets = [0, 34], sizes = [4, 256], strides = [1, 1]} : vector<4x290xf32> to vector<4x256xf32>
    %c15_i32_39 = arith.constant 15 : i32
    %100 = vector.broadcast %c15_i32_39 : i32 to vector<1x256xi32>
    %101 = arith.cmpi slt, %19, %100 : vector<1x256xi32>
    %cst_40 = arith.constant 0.000000e+00 : f32
    %102 = vector.shape_cast %101 : vector<1x256xi1> to vector<1x256xi1>
    %103 = vector.broadcast %102 : vector<1x256xi1> to vector<4x256xi1>
    %104 = vector.broadcast %cst_40 : f32 to vector<4x256xf32>
    %105 = arith.select %103, %99, %104 : vector<4x256xi1>, vector<4x256xf32>
    %c8 = arith.constant 8 : index
    %c0_41 = arith.constant 0 : index
    %c0_42 = arith.constant 0 : index
    %106 = vector.load %arg2[%c8, %c0_41, %c0_42] : memref<9x8x4xbf16, #tpu.memory_space<vmem>>, vector<1x8x4xbf16>
    %107 = vector.shape_cast %106 : vector<1x8x4xbf16> to vector<8x4xbf16>
    %108 = arith.extf %107 : vector<8x4xbf16> to vector<8x4xf32>
    %cst_43 = arith.constant dense<0.000000e+00> : vector<8x256xf32>
    %109 = tpu.matmul %108, %105, %cst_43 {dimension_numbers = #tpu.dot_dimension_numbers<[1], [0], [0], [1], [0, 0, 1, 1], [], []>} : vector<8x4xf32>, vector<4x256xf32>, vector<8x256xf32> -> vector<8x256xf32>
    %110 = arith.addf %98, %109 : vector<8x256xf32>
    %c0_44 = arith.constant 0 : index
    %c0_45 = arith.constant 0 : index
    %111 = vector.load %arg3[%c0_44, %c0_45] : memref<8x1xf32, #tpu.memory_space<vmem>>, vector<8x1xf32>
    %112 = vector.broadcast %111 : vector<8x1xf32> to vector<8x256xf32>
    %113 = arith.addf %110, %112 : vector<8x256xf32>
    %cst_46 = arith.constant 0.000000e+00 : f32
    %114 = vector.broadcast %cst_46 : f32 to vector<8x256xf32>
    %115 = arith.maximumf %113, %114 : vector<8x256xf32>
    %c0_47 = arith.constant 0 : index
    %c0_48 = arith.constant 0 : index
    %c0_49 = arith.constant 0 : index
    %116 = vector.load %arg4[%c0_47, %c0_48, %c0_49] : memref<1x8x256xf32, #tpu.memory_space<vmem>>, vector<1x8x256xf32>
    %117 = vector.shape_cast %116 : vector<1x8x256xf32> to vector<8x256xf32>
    %118 = vector.shape_cast %115 : vector<8x256xf32> to vector<1x8x256xf32>
    tpu.vector_store %arg4[%c0_47, %c0_48, %c0_49], %118 {strides = array<i32>} : memref<1x8x256xf32, #tpu.memory_space<vmem>>, vector<1x8x256xf32>,
    return
  }
  func.func @transform_0(%arg0: i32) -> (i32, i32, i32) {
    %c0_i32 = arith.constant 0 : i32
    %c0_i32_0 = arith.constant 0 : i32
    %c0_i32_1 = arith.constant 0 : i32
    return %arg0, %c0_i32, %c0_i32_0 : i32, i32, i32
  }
  func.func @transform_1(%arg0: i32) -> (i32, i32, i32) {
    %c0_i32 = arith.constant 0 : i32
    %c0_i32_0 = arith.constant 0 : i32
    %c0_i32_1 = arith.constant 0 : i32
    %c0_i32_2 = arith.constant 0 : i32
    return %c0_i32, %c0_i32_0, %c0_i32_1 : i32, i32, i32
  }
  func.func @transform_2(%arg0: i32) -> (i32, i32) {
    %c0_i32 = arith.constant 0 : i32
    %c0_i32_0 = arith.constant 0 : i32
    %c0_i32_1 = arith.constant 0 : i32
    return %c0_i32, %c0_i32_0 : i32, i32
  }
  func.func @transform_3(%arg0: i32) -> (i32, i32, i32) {
    %c0_i32 = arith.constant 0 : i32
    %c0_i32_0 = arith.constant 0 : i32
    %c0_i32_1 = arith.constant 0 : i32
    return %arg0, %c0_i32, %c0_i32_0 : i32, i32, i32
  }
}

</mosaic_0001>

<bundles_post_ra>
// kernel: tpu_custom_call.1
= control target key start
LH: loop header
LB: loop body
LE: loop exit
PB: predicated region body
PF: predicated region fallthrough
CT: control target
= control target key end

     0   :  { %8 = vsyncpa [#allocation3], 0  ;;  %s1324_s0 = inlined_call_operand.vmem [shape: bf16[2,4,290], index: 0, kind: input, shape index: {}]   ;;  %s1325_s1 = inlined_call_operand.vmem [shape: bf16[9,8,4], index: 1, kind: input, shape index: {}]   ;;  %s1326_s2 = inlined_call_operand.vmem [shape: f32[8,1], index: 2, kind: input, shape index: {}]   ;;  %s1327_s3 = inlined_call_operand.hbm [shape: f32[2,8,256], index: 3, kind: output, shape index: {}]  }
   0x1   :  { %10 = vsyncpa [#allocation3 + $0x1], 0  ;;  %s1128_s12 = smov 0   ;;  %s1130_s13 = smov 0  }
   0x2   :  { %s1132_s14 = smov 0   ;;  %s1134_s15 = smov 0  }
   0x3 LB: > { %s1149_s16 = sadd.s32 4294967295, %s1097_s15   ;;  %s925_s17 = sadd.s32 4294967294, %s1097_s15   ;;  %s1097_s15 = sphi %s1134_s15, %s1341_s15   ;;  %s1093_s14 = sphi %s1132_s14, %s1340_s14   ;;  %s1089_s13 = sphi %s1130_s13, %s1339_s13   ;;  %s1085_s12 = sphi %s1128_s12, %s1338_s12  }
   0x4   : > { %s1153_s18 = sadd.s32 1, %s1097_s15   ;;  %s91_s19 = sadd.s32 1, %s1093_s14 }
   0x5   : > { %s88_s20 = ssub.s32 %s1097_s15, %s1153_s18  ;;  %p101_p0 = scmp.ne.s32.totalorder %s1093_s14, %s1089_s13 }
   0x6   : > { %p89_p1 = scmp.eq.s32.totalorder %s88_s20, 0  ;;  %p102_p2 = scmp.eq.s32.totalorder %s1149_s16, 1 }
   0x7   : > { %p107_p3 = scmp.ne.s32.totalorder %s1089_s13, %s1085_s12  ;;  %p108_p4 = scmp.eq.s32.totalorder %s925_s17, 1 }
   0x8   : > { %s1164_s21 = scalar_select %p89_p1, %s1093_s14, %s91_s19  }
   0x9   : > { %p1166_p5 = por %p102_p2, %p101_p0  ;;  %p1170_p6 = por %p108_p4, %p107_p3 }
   0xa   : > { %p928_p7 = scmp.ge.s32.totalorder %s1097_s15, 1  ;;  %p140_p8 = scmp.lt.s32.totalorder %s1097_s15, 3 }
   0xc   : > { %p141_p9 = pnand %p928_p7, %p140_p8 }
   0xd   : > { %p164_p10 = scmp.lt.s32.totalorder (!%p141_p9), %s1149_s16, 1  ;;  %s1099_s29 = smov (!%p141_p9), 127  }
   0xe   : > { %144 = sbr.rel (%p141_p9) target bundleno = 355 (0x163), region = 32  ;;  %s1100_s30 = smov (!%p141_p9), 126  }
   0xf   : > { %s1101_s4 = smov (!%p141_p9), 112   ;;  %s1102_s5 = smov (!%p141_p9), 111  }
  0x10   : > { %s1103_s6 = smov (!%p141_p9), 110   ;;  %s1104_s7 = smov (!%p141_p9), 96  }
  0x11   : > { %s1105_s8 = smov (!%p141_p9), 95   ;;  %s1106_s9 = smov (!%p141_p9), 94  }
  0x12   : > { %s1055_s26 = scalar_lea.hbm (!%p141_p9), %s1327_s3, 32 }
  0x13   : > { %s165_s24 = scalar_select %p164_p10, %s1149_s16, 1  ;;  %v172_v29 = vlaneseq  ;;  %v982_v36 = vld [vmem:[%s1325_s1] sm:$0xff]   ;;  %vm238_vm2 = vcmask 1043456   ;;  %vm234_vm3 = vcmask 31744   ;;  %vm350_vm4 = vcmask 1031168   ;;  %v940_v57 = vld [vmem:[%s1325_s1 + $0x8] sm:$0xff]  }
  0x14   : > { %v983_v39 = vunpack.c.l.bf16 %v982_v36  ;;  %vm231_vm5 = vcmask 1039360   ;;  %v984_v50 = vunpack.c.h.bf16 %v982_v36  ;;  %vm423_vm8 = vcmask 916480  }
  0x15   : > { %s985_s25 = smul.u32 6, %s165_s24  ;;  %v173_v30 = vand.u32 127, %v172_v29  ;;  %v359_v60 = vunpack.c.l.bf16 %v940_v57  ;;  %v432_v63 = vunpack.c.h.bf16 %v940_v57  ;;  %vm499_vm9 = vcmask 908288  }
  0x16   : > { %vm563_vm10 = vcmask 900096   ;;  %vm636_vm11 = vcmask 785408   ;;  %vm712_vm12 = vcmask 777216   ;;  %vm776_vm13 = vcmask 769024  }
  0x17   : > { %s168_s28 = scalar_lea.vmem %s1324_s0, %s985_s25  ;;  %v174_v31 = vadd.s32 128, %v173_v30  ;;  %v179_v32 = vand.u32 15, %v173_v30 }
  0x18   : > { %v169_v0 = vld [vmem:[%s168_s28] sm:$0x3f] }
  0x19   : > { %v171_v1 = vunpack.c.h.bf16 %v169_v0  ;;  %v1181_v2 = vunpack.c.l.bf16 %v169_v0  ;;  %v186_v33 = vand.u32 15, %v174_v31  ;;  %vm1196_vm0 = vcmp.ge.s32.totalorder %v179_v32, 1 }
  0x1a   : > { %vm1217_vm6 = vcmp.lt.s32.totalorder %v179_v32, 15 }
  0x1b   : > { %221 = vst [vmem:[#allocation1 + $0x10] ss:$2 sm:$0xff] %v171_v1  ;;  %vm1200_vm1 = vcmp.ge.s32.totalorder %v186_v33, 1  ;;  %vm1221_vm7 = vcmp.lt.s32.totalorder %v186_v33, 15  ;;  %v970_v33 = vld [vmem:[%s1325_s1 + $0x20] sm:$0xf] }
  0x1c   : > { %206 = vst [vmem:[#allocation1] ss:$2 sm:$0xff] %v1181_v2 }
  0x22   : > { %v224_v3 = vld.sshfl [vmem:[#allocation1 + $0x10] sm:$0xff pattern:$0x75316420] }
  0x23   : > { %229 = vrot.lane.b32.xlu1 %v224_v3, %s1099_s29  ;;  %340 = vst [vmem:[#allocation1 + $0x10] ss:$2 sm:$0xff] %v171_v1  ;;  %v1184_v4 = vld.sshfl [vmem:[#allocation1] sm:$0xff pattern:$0x75316420] }
  0x24   : > { %v1186_v5 = vld.sshfl [vmem:[#allocation1 + $0x8] sm:$0xff pattern:$0x75316420]  ;;  %v211_v37 = vsel %vm1196_vm0, %v1184_v4, 0.0 }
  0x25   : > { %219 = vst [vmem:[#allocation1] ss:$2 sm:$0xff] %v1181_v2  ;;  %v212_v38 = vsel %vm1200_vm1, %v1186_v5, 0.0  ;;  %936 = vmatpush.msk.msra.mxu2 %vm238_vm2, %v211_v37  ;;  %v785_v37 = vunpack.c.l.bf16 %v970_v33 }
  0x26   : > { %938 = vmatpush.msk.msra.mxu3 %vm238_vm2, %v212_v38  ;;  %937 = vmatmul.msk.f32.vlgmr.msra.gmra.mxu2 %vm234_vm3, %v983_v39 }
  0x27   : > { %939 = vmatmul.msk.f32.vlgmr.msra.gmra.mxu3 %vm234_vm3, %v983_v39 }
  0x2a   : > { %v343_v6 = vld.sshfl [vmem:[#allocation1 + $0x10] sm:$0xff pattern:$0x75316420] }
  0x2b   : > { %348 = vrot.lane.b32.xlu2 %v343_v6, %s1100_s30  ;;  %413 = vst [vmem:[#allocation1 + $0x10] ss:$2 sm:$0xff] %v171_v1 }
  0x2c   : > { %v222_v7 = vld.sshfl [vmem:[#allocation1] sm:$0xff pattern:$0x75316420]  ;;  %v223_v8 = vld.sshfl [vmem:[#allocation1 + $0x8] sm:$0xff pattern:$0x75316420] }
  0x2d   : > { %225 = vrot.lane.b32.xlu0 %v222_v7, %s1099_s29  ;;  %338 = vst [vmem:[#allocation1] ss:$2 sm:$0xff] %v1181_v2 }
  0x32   : > { %v416_v9 = vld.sshfl [vmem:[#allocation1 + $0x10] sm:$0xff pattern:$0x75316420] }
  0x33   : > { %489 = vst [vmem:[#allocation1 + $0x10] ss:$2 sm:$0xff] %v171_v1 }
  0x34   : > { %v341_v10 = vld.sshfl [vmem:[#allocation1] sm:$0xff pattern:$0x75316420]  ;;  %v342_v11 = vld.sshfl [vmem:[#allocation1 + $0x8] sm:$0xff pattern:$0x75316420] }
  0x35   : > { %227 = vrot.lane.b32.xlu0 %v223_v8, %s1099_s29  ;;  %344 = vrot.lane.b32.xlu1 %v341_v10, %s1100_s30  ;;  %411 = vst [vmem:[#allocation1] ss:$2 sm:$0xff] %v1181_v2  ;;  %v1107_v10 = vmov 0  }
  0x36   : > { %346 = vrot.lane.b32.xlu2 %v342_v11, %s1100_s30  ;;  %1034 = vset.pattern.permute.xlu0 %v1107_v10 }
  0x3a   : > { %v492_v12 = vld.sshfl [vmem:[#allocation1 + $0x10] sm:$0xff pattern:$0x75316420] }
  0x3b   : > { %553 = vst [vmem:[#allocation1 + $0x10] ss:$2 sm:$0xff] %v171_v1 }
  0x3c   : > { %v415_v13 = vld.sshfl [vmem:[#allocation1 + $0x8] sm:$0xff pattern:$0x75316420]  ;;  %v414_v14 = vld.sshfl [vmem:[#allocation1] sm:$0xff pattern:$0x75316420] }
  0x3d   : > { %419 = vrot.lane.b32.xlu1 %v415_v13, %s1101_s4  ;;  %417 = vrot.lane.b32.xlu0 %v414_v14, %s1101_s4  ;;  %487 = vst [vmem:[#allocation1] ss:$2 sm:$0xff] %v1181_v2 }
  0x3e   : > { %421 = vrot.lane.b32.xlu2 %v416_v9, %s1101_s4  ;;  %v837_v9 = vld [vmem:[%s1326_s2] sm:$0xff]  ;;  %s161_s4 = sand.u32 1, %s1089_s13  }
  0x42   : > { %v556_v15 = vld.sshfl [vmem:[#allocation1 + $0x10] sm:$0xff pattern:$0x75316420] }
  0x43   : > { %626 = vst [vmem:[#allocation1 + $0x10] ss:$2 sm:$0xff] %v171_v1 }
  0x44   : > { %v491_v16 = vld.sshfl [vmem:[#allocation1 + $0x8] sm:$0xff pattern:$0x75316420]  ;;  %v490_v17 = vld.sshfl [vmem:[#allocation1] sm:$0xff pattern:$0x75316420] }
  0x45   : > { %495 = vrot.lane.b32.xlu1 %v491_v16, %s1102_s5  ;;  %493 = vrot.lane.b32.xlu0 %v490_v17, %s1102_s5  ;;  %551 = vst [vmem:[#allocation1] ss:$2 sm:$0xff] %v1181_v2 }
  0x46   : > { %497 = vrot.lane.b32.xlu2 %v492_v12, %s1102_s5  ;;  %s929_s5 = sshll.u32 %s161_s4, 4 }
  0x47   : > { %s163_s10 = scalar_lea.vmem [#allocation2], %s929_s5 }
  0x48   : > { %s863_s11 = sshll.u32 %s163_s10, 4  ;;  %s864_s11 = int_to_ptr.vmem [resolvable:$true] %s863_s11 }
  0x4a   : > { %v629_v18 = vld.sshfl [vmem:[#allocation1 + $0x10] sm:$0xff pattern:$0x75316420] }
  0x4b   : > { %702 = vst [vmem:[#allocation1 + $0x10] ss:$2 sm:$0xff] %v171_v1 }
  0x4c   : > { %v555_v19 = vld.sshfl [vmem:[#allocation1 + $0x8] sm:$0xff pattern:$0x75316420]  ;;  %v554_v20 = vld.sshfl [vmem:[#allocation1] sm:$0xff pattern:$0x75316420] }
  0x4d   : > { %559 = vrot.lane.b32.xlu1 %v555_v19, %s1103_s6  ;;  %557 = vrot.lane.b32.xlu0 %v554_v20, %s1103_s6  ;;  %624 = vst [vmem:[#allocation1] ss:$2 sm:$0xff] %v1181_v2  ;;  %v960_v19 = vld [vmem:[%s1325_s1 + $0x18] sm:$0xff]  }
  0x4e   : > { %561 = vrot.lane.b32.xlu2 %v556_v15, %s1103_s6  ;;  %s980_s6 = sshll.u32 %s1149_s16, 4  ;;  %s850_s16 = scalar_lea.sflag [#allocation3], %s161_s4 }
  0x52   : > { %v705_v21 = vld.sshfl [vmem:[#allocation1 + $0x10] sm:$0xff pattern:$0x75316420] }
  0x53   : > { %766 = vst [vmem:[#allocation1 + $0x10] ss:$2 sm:$0xff] %v171_v1 }
  0x54   : > { %v628_v22 = vld.sshfl [vmem:[#allocation1 + $0x8] sm:$0xff pattern:$0x75316420]  ;;  %v627_v23 = vld.sshfl [vmem:[#allocation1] sm:$0xff pattern:$0x75316420] }
  0x55   : > { %632 = vrot.lane.b32.xlu1 %v628_v22, %s1104_s7  ;;  %630 = vrot.lane.b32.xlu0 %v627_v23, %s1104_s7  ;;  %700 = vst [vmem:[#allocation1] ss:$2 sm:$0xff] %v1181_v2  ;;  %v645_v22 = vunpack.c.l.bf16 %v960_v19 }
  0x56   : > { %634 = vrot.lane.b32.xlu2 %v629_v18, %s1104_s7 }
  0x5a   : > { %v769_v26 = vld.sshfl [vmem:[#allocation1 + $0x10] sm:$0xff pattern:$0x75316420] }
  0x5c   : > { %v704_v24 = vld.sshfl [vmem:[#allocation1 + $0x8] sm:$0xff pattern:$0x75316420]  ;;  %v703_v25 = vld.sshfl [vmem:[#allocation1] sm:$0xff pattern:$0x75316420] }
  0x5d   : > { %708 = vrot.lane.b32.xlu1 %v704_v24, %s1105_s8  ;;  %706 = vrot.lane.b32.xlu0 %v703_v25, %s1105_s8  ;;  %764 = vst [vmem:[#allocation1] ss:$2 sm:$0xff] %v1181_v2  ;;  %v950_v2 = vld [vmem:[%s1325_s1 + $0x10] sm:$0xff]  }
  0x5e   : > { %710 = vrot.lane.b32.xlu2 %v705_v21, %s1105_s8  ;;  %v486_v6 = vunpack.c.l.bf16 %v950_v2  ;;  %v572_v13 = vunpack.c.h.bf16 %v950_v2 }
  0x64   : > { %v768_v27 = vld.sshfl [vmem:[#allocation1 + $0x8] sm:$0xff pattern:$0x75316420]  ;;  %v767_v28 = vld.sshfl [vmem:[#allocation1] sm:$0xff pattern:$0x75316420] }
  0x65   : > { %772 = vrot.lane.b32.xlu1 %v768_v27, %s1106_s9  ;;  %770 = vrot.lane.b32.xlu0 %v767_v28, %s1106_s9  ;;  %v699_v28 = vunpack.c.h.bf16 %v960_v19 }
  0x66   : > { %774 = vrot.lane.b32.xlu2 %v769_v26, %s1106_s9  ;;  %s861_s9 = scalar_lea.hbm %s1327_s3, %s980_s6 }
  0x67   : > { %s865_s17 = sshll.u32 %s861_s9, 4  ;;  %s866_s17 = int_to_ptr.hbm [resolvable:$true] %s865_s17 }
  0x68   : > { %s1049_s19 = sshra.s32 %s866_s17, 4  ;;  %s1050_s19 = int_to_ptr.hbm [resolvable:$true] %s1049_s19 }
  0x69   : > { %s1051_s20 = scalar_lea.hbm %s1050_s19, 16  ;;  %p1056_p0 = scmp.lt.s32.totalorder %s1050_s19, %s1327_s3 }
  0x6a   : > { %p1052_p11 = scmp.ne.s32.totalorder %s1050_s19, %s1051_s20  ;;  %p1057_p1 = scmp.lt.s32.totalorder %s1055_s26, %s1051_s20 }
  0x6c   : > { %p1053_p12 = pnand %p1052_p11, %p1166_p5  ;;  %p1058_p2 = por %p1057_p1, %p1056_p0 }
  0x6d   : > { %840 = vperm.xlu0 %1034, %v837_v9  }
  0x6e   : > { %p1054_p13 = pneg %p1053_p12 }
  0x70   : > { %p1059_p3 = pnand %p1058_p2, %p1054_p13 }
  0x85   : > { %v349_v40 = vpop.permute.xlu2 %348 }
  0x90   : > { %v347_v41 = vpop.permute.xlu2 %346 }
  0x91   : > { %v352_v45 = vsel %vm350_vm4, %v347_v41, %v349_v40 }
  0x92   : > { %v356_v55 = vsel %vm1221_vm7, %v352_v45, 0.0 }
  0x95   : > { %v230_v42 = vpop.permute.xlu1 %229 }
  0x98   : > { %v422_v44 = vpop.permute.xlu2 %421 }
  0x9f   : > { %v226_v43 = vpop.permute.xlu0 %225 }
  0xa0   : > { %v498_v56 = vpop.permute.xlu2 %497 }
  0xa7   : > { %v228_v48 = vpop.permute.xlu0 %227  ;;  %v345_v49 = vpop.permute.xlu1 %344 }
  0xa8   : > { %v351_v51 = vsel %vm350_vm4, %v345_v49, %v347_v41  ;;  %v232_v52 = vsel %vm231_vm5, %v226_v43, %v228_v48  ;;  %v233_v53 = vsel %vm231_vm5, %v228_v48, %v230_v42  ;;  %v562_v3 = vpop.permute.xlu2 %561 }
  0xa9   : > { %932 = vmatpush.msk.msra.mxu0 %vm238_vm2, %v232_v52  ;;  %934 = vmatpush.msk.msra.mxu1 %vm238_vm2, %v233_v53  ;;  %v355_v54 = vsel %vm1217_vm6, %v351_v51, 0.0 }
  0xaa   : > { %933 = vmatmul.msk.f32.vlgmr.msra.gmra.mxu0 %vm234_vm3, %v984_v50  ;;  %935 = vmatmul.msk.f32.vlgmr.msra.gmra.mxu1 %vm234_vm3, %v984_v50  ;;  %v329_v45 = vpop.f32.mrf.mxu3 }
  0xab   : > { %941 = vmatpush.msk.msrb.mxu0 %vm238_vm2, %v355_v54  ;;  %943 = vmatpush.msk.msrb.mxu1 %vm238_vm2, %v356_v55 }
  0xaf   : > { %v420_v58 = vpop.permute.xlu1 %419  ;;  %v418_v59 = vpop.permute.xlu0 %417 }
  0xb0   : > { %v425_v61 = vsel %vm423_vm8, %v420_v58, %v422_v44  ;;  %v424_v62 = vsel %vm423_vm8, %v418_v59, %v420_v58  ;;  %v635_v18 = vpop.permute.xlu2 %634  ;;  %v309_v44 = vpop.f32.mrf.mxu2 }
  0xb1   : > { %v428_v0 = vsel %vm1196_vm0, %v424_v62, 0.0  ;;  %v429_v1 = vsel %vm1200_vm1, %v425_v61, 0.0 }
  0xb2   : > { %946 = vmatpush.msk.msrb.mxu2 %vm238_vm2, %v428_v0  ;;  %948 = vmatpush.msk.msrb.mxu3 %vm238_vm2, %v429_v1 }
  0xb3   : > { %942 = vmatmul.msk.f32.vlgmr.msrb.gmra.mxu0 %vm234_vm3, %v359_v60  ;;  %944 = vmatmul.msk.f32.vlgmr.msrb.gmra.mxu1 %vm234_vm3, %v359_v60 }
  0xb4   : > { %947 = vmatmul.msk.f32.vlgmr.msrb.gmra.mxu2 %vm234_vm3, %v432_v63  ;;  %949 = vmatmul.msk.f32.vlgmr.msrb.gmra.mxu3 %vm234_vm3, %v432_v63 }
  0xb7   : > { %v496_v4 = vpop.permute.xlu1 %495  ;;  %v494_v5 = vpop.permute.xlu0 %493 }
  0xb8   : > { %v501_v7 = vsel %vm499_vm9, %v496_v4, %v498_v56  ;;  %v500_v8 = vsel %vm499_vm9, %v494_v5, %v496_v4  ;;  %v711_v27 = vpop.permute.xlu2 %710 }
  0xb9   : > { %951 = vmatpush.msk.msra.mxu0 %vm238_vm2, %v500_v8  ;;  %953 = vmatpush.msk.msra.mxu1 %vm238_vm2, %v501_v7 }
  0xbb   : > { %952 = vmatmul.msk.f32.vlgmr.msra.gmra.mxu0 %vm234_vm3, %v486_v6  ;;  %954 = vmatmul.msk.f32.vlgmr.msra.gmra.mxu1 %vm234_vm3, %v486_v6 }
  0xbf   : > { %v560_v11 = vpop.permute.xlu1 %559  ;;  %v558_v12 = vpop.permute.xlu0 %557 }
  0xc0   : > { %v565_v14 = vsel %vm563_vm10, %v560_v11, %v562_v3  ;;  %v564_v15 = vsel %vm563_vm10, %v558_v12, %v560_v11  ;;  %v775_v34 = vpop.permute.xlu2 %774 }
  0xc1   : > { %v569_v16 = vsel %vm1221_vm7, %v565_v14, 0.0  ;;  %v568_v17 = vsel %vm1217_vm6, %v564_v15, 0.0 }
  0xc2   : > { %956 = vmatpush.msk.msra.mxu2 %vm238_vm2, %v568_v17  ;;  %958 = vmatpush.msk.msra.mxu3 %vm238_vm2, %v569_v16 }
  0xc3   : > { %957 = vmatmul.msk.f32.vlgmr.msra.gmra.mxu2 %vm234_vm3, %v572_v13  ;;  %959 = vmatmul.msk.f32.vlgmr.msra.gmra.mxu3 %vm234_vm3, %v572_v13 }
  0xc7   : > { %v633_v20 = vpop.permute.xlu1 %632  ;;  %v631_v21 = vpop.permute.xlu0 %630 }
  0xc8   : > { %v638_v23 = vsel %vm636_vm11, %v633_v20, %v635_v18  ;;  %v637_v24 = vsel %vm636_vm11, %v631_v21, %v633_v20 }
  0xc9   : > { %v642_v25 = vsel %vm1200_vm1, %v638_v23, 0.0  ;;  %v641_v26 = vsel %vm1196_vm0, %v637_v24, 0.0 }
  0xca   : > { %961 = vmatpush.msk.msrb.mxu0 %vm238_vm2, %v641_v26  ;;  %963 = vmatpush.msk.msrb.mxu1 %vm238_vm2, %v642_v25 }
  0xcb   : > { %962 = vmatmul.msk.f32.vlgmr.msrb.gmra.mxu0 %vm234_vm3, %v645_v22  ;;  %964 = vmatmul.msk.f32.vlgmr.msrb.gmra.mxu1 %vm234_vm3, %v645_v22 }
  0xcf   : > { %v709_v29 = vpop.permute.xlu1 %708  ;;  %v707_v30 = vpop.permute.xlu0 %706 }
  0xd0   : > { %v714_v31 = vsel %vm712_vm12, %v709_v29, %v711_v27  ;;  %v713_v32 = vsel %vm712_vm12, %v707_v30, %v709_v29 }
  0xd1   : > { %966 = vmatpush.msk.msrb.mxu2 %vm238_vm2, %v713_v32  ;;  %968 = vmatpush.msk.msrb.mxu3 %vm238_vm2, %v714_v31 }
  0xd2   : > { %967 = vmatmul.msk.f32.vlgmr.msrb.gmra.mxu2 %vm234_vm3, %v699_v28  ;;  %969 = vmatmul.msk.f32.vlgmr.msrb.gmra.mxu3 %vm234_vm3, %v699_v28 }
  0xd7   : > { %v773_v35 = vpop.permute.xlu1 %772  ;;  %v771_v36 = vpop.permute.xlu0 %770 }
  0xd8   : > { %v778_v38 = vsel %vm776_vm13, %v773_v35, %v775_v34  ;;  %v777_v39 = vsel %vm776_vm13, %v771_v36, %v773_v35 }
  0xd9   : > { %v782_v40 = vsel %vm1221_vm7, %v778_v38, 0.0  ;;  %v781_v41 = vsel %vm1217_vm6, %v777_v39, 0.0 }
  0xda   : > { %971 = vmatpush.msk.msra.mxu0 %vm238_vm2, %v781_v41  ;;  %973 = vmatpush.msk.msra.mxu1 %vm238_vm2, %v782_v40 }
  0xdb   : > { %972 = vmatmul.msk.f32.vlgmr.msra.gmra.mxu0 %vm234_vm3, %v785_v37  ;;  %974 = vmatmul.msk.f32.vlgmr.msra.gmra.mxu1 %vm234_vm3, %v785_v37 }
  0xdf   : > { %v841_v8 = vpop.permute.xlu0 %840 }
 0x127   : > { %v260_v42 = vpop.f32.mrf.mxu0  ;;  %v280_v43 = vpop.f32.mrf.mxu1 }
 0x128   : > { %v310_v50 = vadd.f32 %v309_v44, %v260_v42  ;;  %v330_v47 = vadd.f32 %v329_v45, %v280_v43 }
 0x130   : > { %v386_v48 = vpop.f32.mrf.mxu0  ;;  %v406_v49 = vpop.f32.mrf.mxu1 }
 0x131   : > { %v409_v52 = vadd.f32 %v386_v48, %v310_v50  ;;  %v410_v53 = vadd.f32 %v406_v49, %v330_v47 }
 0x137   : > { %v459_v51 = vpop.f32.mrf.mxu2  ;;  %v479_v46 = vpop.f32.mrf.mxu3 }
 0x138   : > { %v526_v54 = vpop.f32.mrf.mxu0  ;;  %v546_v55 = vpop.f32.mrf.mxu1  ;;  %v482_v56 = vadd.f32 %v459_v51, %v409_v52  ;;  %v483_v57 = vadd.f32 %v479_v46, %v410_v53 }
 0x13a   : > { %v549_v60 = vadd.f32 %v526_v54, %v482_v56  ;;  %v550_v61 = vadd.f32 %v546_v55, %v483_v57 }
 0x146   : > { %v599_v58 = vpop.f32.mrf.mxu2  ;;  %v619_v59 = vpop.f32.mrf.mxu3 }
 0x147   : > { %v622_v62 = vadd.f32 %v599_v58, %v549_v60  ;;  %v623_v63 = vadd.f32 %v619_v59, %v550_v61 }
 0x148   : > { %v672_v0 = vpop.f32.mrf.mxu0  ;;  %v692_v1 = vpop.f32.mrf.mxu1 }
 0x149   : > { %v695_v2 = vadd.f32 %v672_v0, %v622_v62  ;;  %v696_v3 = vadd.f32 %v692_v1, %v623_v63 }
 0x155   : > { %v739_v4 = vpop.f32.mrf.mxu2  ;;  %v759_v5 = vpop.f32.mrf.mxu3 }
 0x156   : > { %v762_v6 = vadd.f32 %v739_v4, %v695_v2  ;;  %v763_v7 = vadd.f32 %v759_v5, %v696_v3 }
 0x158   : > { %v812_v9 = vpop.f32.mrf.mxu0  ;;  %v832_v10 = vpop.f32.mrf.mxu1 }
 0x159   : > { %v835_v11 = vadd.f32 %v812_v9, %v762_v6  ;;  %v836_v12 = vadd.f32 %v832_v10, %v763_v7 }
 0x15b   : > { %v843_v13 = vadd.f32 %v841_v8, %v835_v11  ;;  %v844_v14 = vadd.f32 %v841_v8, %v836_v12 }
 0x15d   : > { %v845_v15 = vmax.f32 %v843_v13, 0.0  ;;  %v846_v16 = vmax.f32 %v844_v14, 0.0 }
 0x15f   : > { %847 = vst [vmem:[%s163_s10] sm:$0xff] %v845_v15 }
 0x160   : > { %848 = vst [vmem:[%s163_s10 + $0x8] sm:$0xff] %v846_v16 }
 0x161   : > { %1062 = shalt.err (!%p1059_p3)
}
 0x162   : > { %986 = dma.vmem_to_hbm [thread:$0]  (%p1166_p5), %s864_s11, 256, %s866_s17, %s850_s16  }
 0x163 PF: > { %p992_p4 = scmp.ge.s32.totalorder %s1097_s15, 2  ;;  %s877_s29 = sand.u32 1, %s1085_s12  }
 0x164   : > { %s878_s30 = scalar_lea.sflag [#allocation3], %s877_s29 }
 0x165   : > { %p989_p7 = pnand %p992_p4, %p1170_p6 }
 0x167   : > { %p990_p8 = pneg %p989_p7 }
 0x169   : > { %1080 = dma.done.wait (%p990_p8), %s878_s30, 256  }
 0x16a   : > { %1082 = vsyncadd (%p990_p8), %s878_s30, 4294967040  ;;  %p13_p9 = scmp.ge.s32.totalorder %s1153_s18, 4   ;;  %s1338_s12 = smov %s1089_s13 }
 0x16b   : > { %s1339_s13 = smov %s1093_s14  ;;  %s1340_s14 = smov %s1164_s21 }
 0x16c   : > { %s1341_s15 = smov %s1153_s18  ;;  %15 = sbr.rel (!%p13_p9) target bundleno = 3 (0x3), region = 83 }
 0x171   :  { %884 = vsyncpa [#allocation3], 1 }
 0x172   :  { %886 = vsyncpa [#allocation3 + $0x1], 1 }

</bundles_post_ra>
